<compile_context>
chip_gen: v6e
topology: v6e:2x2x1
jax: 0.10.0
libtpu: 0.0.40
codegen_flags: <defaults>
</compile_context>

<pallas_src>
import functools

import jax
import jax.numpy as jnp
from jax import lax
from jax.experimental import pallas as pl
from jax.experimental.pallas import tpu as pltpu


def _round_up(x, m):
    return (x + m - 1) // m * m


def _choose_flat_tile(l_out, wp, kh, itemsize, flat_tile=None):
    """Lane tile (multiple of 128) for the flattened candidate-output axis."""
    if flat_tile is not None:
        tp = _round_up(int(flat_tile), 128)
    else:
        # f32: keep the working set friendly to v5e's vreg file; bf16: go wider.
        base = 1024 if itemsize >= 4 else 2048
        halo = (kh - 1) * wp
        tp = max(base, _round_up(2 * max(halo, 1), 128))  # amortize halo on wide images
        tp = min(tp, 8192)
    tp = min(tp, _round_up(l_out, 128))
    num_tiles = -(-l_out // tp)
    return tp, num_tiles


def _tc_conv2d_kernel(x_hbm, wc_ref, b_ref, o_ref, xbuf, sem, *,
                      KH, KW, Wp, TP, SLAB, T):
    """Fully folded TC-Conv2d tile.

    x_hbm : (N, Cin, LP)     flattened, spatially padded input (HBM, manual DMA)
    wc_ref: (KH*KW, Cout, Cin) folded tap weights (in_conv . mid_tap . out_conv)
    b_ref : (Cout, 1)        f32 bias
    o_ref : (Cout, TP)       flattened candidate-output tile (lane-dense)
    xbuf  : (2, Cin, SLAB)   double-buffered input halo window (VMEM scratch)
    sem   : (2,)             DMA semaphores
    """
    n = pl.program_id(0)
    t = pl.program_id(1)
    slot = t % 2

    def window(tile, sl):
        return pltpu.make_async_copy(
            x_hbm.at[n, :, pl.ds(tile * TP, SLAB)], xbuf.at[sl], sem.at[sl])

    @pl.when(t == 0)
    def _():                      # prime the pipeline at the start of each image
        window(0, 0).start()

    @pl.when(t + 1 < T)
    def _():                      # prefetch the next window behind this compute
        window(t + 1, 1 - slot).start()

    window(t, slot).wait()
    slab = xbuf.at[slot]          # (Cin, SLAB) VMEM view of the current window

    cout = o_ref.shape[0]
    acc = jnp.zeros((cout, TP), jnp.float32)
    # Implicit im2col: each tap is a statically shifted lane slice of the window,
    # read ONCE and fed straight to the MXU with its folded (Cout, Cin) weight.
    for kh in range(KH):
        for kw in range(KW):
            k = kh * KW + kw
            tap = slab[:, pl.ds(kh * Wp + kw, TP)]            # (Cin, TP)
            acc = acc + jnp.dot(wc_ref[k], tap,
                                preferred_element_type=jnp.float32)

    o_ref[...] = (acc + b_ref[...]).astype(o_ref.dtype)       # f32 bias, one cast


def tc_conv2d_forward(x, w_in, w_mid, w_out, b_out, *, rank, kernel_size,
                      stride, padding, compute_dtype=jnp.bfloat16,
                      flat_tile=None):
    """Pallas implementation of TC_Conv_2D.forward. x is NCHW, returns NCHW."""
    N, Cin, H, W = x.shape
    R0, R1, R2 = rank
    KH, KW = kernel_size
    sh, sw = stride
    ph, pw = padding
    Cout = w_out.shape[0]
    Hout, Wout = H // sh, W // sw          # module semantics: int(H / stride)

    # The module's reshape only works for these geometries; they also keep the
    # flat (implicit-GEMM) indexing below in bounds.
    assert (H + 2 * ph - KH) // sh + 1 == Hout, "unsupported conv geometry"
    assert (W + 2 * pw - KW) // sw + 1 == Wout, "unsupported conv geometry"

    # ---- fold in_conv AND out_conv into the KH*KW tap weights (tiny, in XLA) --
    # Wc[kh,kw,o,c] = sum_{r0,r2,r1} W3[o,r0,r2] * B[r2,r1,kh,kw] * A[r0,r1,c]
    A3 = w_in.reshape(R0, R1, Cin).astype(jnp.float32)
    B3 = w_mid[:, :, 0, :, :].astype(jnp.float32)              # (R2, R1, KH, KW)
    W3r = w_out.reshape(Cout, R0, R2).astype(jnp.float32)
    Wc = jnp.einsum('ops,srhw,prc->hwoc', W3r, B3, A3)
    Wc = Wc.reshape(KH * KW, Cout, Cin).astype(compute_dtype)
    bias = jnp.zeros((Cout,), jnp.float32) if b_out is None else b_out
    bias = bias.reshape(Cout, 1).astype(jnp.float32)

    # ---- flattened stride-1 candidate-output grid (pixels sit on lanes) ------
    Wp = W + 2 * pw
    H_cand = (Hout - 1) * sh + 1
    L_out = H_cand * Wp
    itemsize = jnp.dtype(compute_dtype).itemsize
    TP, T = _choose_flat_tile(L_out, Wp, KH, itemsize, flat_tile)
    # Halo window per tile, rounded to full 128-lane chunks for the DMA.
    SLAB = _round_up(TP + (KH - 1) * Wp + (KW - 1), 128)

    # ---- spatial zero pad once; bottom-pad enough rows that every halo window
    #      (including the padded tail tiles) stays in bounds reading zeros -----
    lp_needed = (T - 1) * TP + SLAB
    rows = -(-lp_needed // Wp)
    pad_bottom = max(rows - H - ph, ph)
    x_p = jnp.pad(x, ((0, 0), (0, 0), (ph, pad_bottom), (pw, pw)))
    LP = (H + ph + pad_bottom) * Wp
    assert LP >= lp_needed
    x_flat = x_p.reshape(N, Cin, LP).astype(compute_dtype)

    out_dtype = compute_dtype              # bf16 path: half the HBM writeback

    kernel = functools.partial(_tc_conv2d_kernel, KH=KH, KW=KW, Wp=Wp,
                               TP=TP, SLAB=SLAB, T=T)

    # Honest per-step VMEM budget (input is halo-tiled, never whole-image).
    cpad, opad = _round_up(Cin, 8), _round_up(Cout, 8)
    est = (2 * cpad * SLAB * itemsize                         # xbuf double buffer
           + 2 * opad * TP * jnp.dtype(out_dtype).itemsize    # pipelined output
           + 2 * KH * KW * opad * 128 * itemsize              # folded weights
           + opad * 128 * 4                                   # bias
           + (opad * 4 + cpad * itemsize + opad * 4) * TP * 2)  # live-value slack
    vmem_limit = int(min(max(4 * est, 16 * 2 ** 20), 32 * 2 ** 20))

    out_flat = pl.pallas_call(
        kernel,
        out_shape=jax.ShapeDtypeStruct((N, Cout, T * TP), out_dtype),
        grid=(N, T),
        in_specs=[
            pl.BlockSpec(memory_space=pl.ANY),                # manual halo DMA
            pl.BlockSpec((KH * KW, Cout, Cin), lambda n, t: (0, 0, 0)),
            pl.BlockSpec((Cout, 1), lambda n, t: (0, 0)),
        ],
        out_specs=pl.BlockSpec((None, Cout, TP), lambda n, t: (n, 0, t)),
        scratch_shapes=[
            pltpu.VMEM((2, Cin, SLAB), compute_dtype),
            pltpu.SemaphoreType.DMA((2,)),
        ],
        compiler_params=pltpu.CompilerParams(
            dimension_semantics=("parallel", "arbitrary"),
            vmem_limit_bytes=vmem_limit),
    )(x_flat, Wc, bias)

    # Drop padded tail lanes / padded-width columns and subsample for stride.
    out = out_flat[:, :, :L_out].reshape(N, Cout, H_cand, Wp)
    out = out[:, :, ::sh, ::sw][:, :, :Hout, :Wout]
    return out.astype(x.dtype)


def reference_forward(x, w_in, w_mid, w_out, b_out, *,
                      rank, kernel_size, stride, padding):
    """Plain-JAX mirror of the PyTorch forward (independent correctness check)."""
    N, Cin, H, W = x.shape
    R0, R1, R2 = rank
    sh, sw = stride
    ph, pw = padding
    Hout, Wout = H // sh, W // sw
    y = lax.conv_general_dilated(
        x, w_in, window_strides=(1, 1), padding='VALID',
        dimension_numbers=('NCHW', 'OIHW', 'NCHW'))
    y = y.reshape(N, R0, R1, H, W).transpose(0, 2, 1, 3, 4)     # (N,R1,R0,H,W)
    z = lax.conv_general_dilated(
        y, w_mid, window_strides=(1, sh, sw),
        padding=[(0, 0), (ph, ph), (pw, pw)],
        dimension_numbers=('NCDHW', 'OIDHW', 'NCDHW'))          # (N,R2,R0,Ho,Wo)
    z = z.transpose(0, 2, 1, 3, 4).reshape(N, R0 * R2, Hout, Wout)
    out = lax.conv_general_dilated(
        z, w_out, window_strides=(1, 1), padding='VALID',
        dimension_numbers=('NCHW', 'OIHW', 'NCHW'))
    if b_out is not None:
        out = out + b_out.reshape(1, -1, 1, 1)
    return out


if __name__ == "__main__":
    # Small config consistent with the module:
    #   orig_layer = nn.Conv2d(4, 8, kernel_size=3, stride=1, padding=1), rank=(2,3,3)
    N, Cin, Cout = 2, 4, 8
    H = W = 16
    rank = (2, 3, 3)
    kernel_size = (3, 3)
    stride = (1, 1)
    padding = (1, 1)
    R0, R1, R2 = rank
    KH, KW = kernel_size

    key = jax.random.PRNGKey(0)
    kx, k1, k2, k3, kb = jax.random.split(key, 5)
    x = jax.random.normal(kx, (N, Cin, H, W), jnp.float32)
    w_in = 0.2 * jax.random.normal(k1, (R0 * R1, Cin, 1, 1), jnp.float32)
    w_mid = 0.2 * jax.random.normal(k2, (R2, R1, 1, KH, KW), jnp.float32)
    w_out = 0.2 * jax.random.normal(k3, (Cout, R0 * R2, 1, 1), jnp.float32)
    b_out = 0.1 * jax.random.normal(kb, (Cout,), jnp.float32)

    ref = reference_forward(x, w_in, w_mid, w_out, b_out, rank=rank,
                            kernel_size=kernel_size, stride=stride,
                            padding=padding)

    # f32 path: exact (up to rounding) against the reference.
    fwd = jax.jit(functools.partial(
        tc_conv2d_forward, rank=rank, kernel_size=kernel_size,
        stride=stride, padding=padding, compute_dtype=jnp.float32))
    out = jax.block_until_ready(fwd(x, w_in, w_mid, w_out, b_out))
    assert out.shape == (N, Cout, H, W), out.shape
    err = float(jnp.max(jnp.abs(out - ref)))
    assert jnp.allclose(out, ref, atol=1e-4, rtol=1e-4), err

    # bf16 path (default): bf16 MXU + bf16 writeback, f32 accumulation + bias.
    fwd_bf16 = jax.jit(functools.partial(
        tc_conv2d_forward, rank=rank, kernel_size=kernel_size,
        stride=stride, padding=padding, compute_dtype=jnp.bfloat16))
    out_bf16 = jax.block_until_ready(fwd_bf16(x, w_in, w_mid, w_out, b_out))
    err16 = float(jnp.max(jnp.abs(out_bf16 - ref)))
    assert jnp.allclose(out_bf16, ref, atol=5e-2, rtol=5e-2), err16

    print("KERNEL_OK")
</pallas_src>

<mosaic_0001>
module attributes {stable_mosaic.version = 11 : i64} {
  func.func @_tc_conv2d_kernel(%arg0: i32, %arg1: i32, %arg2: memref<2x4x522xf32, #tpu.memory_space<any>>, %arg3: memref<9x8x4xf32, #tpu.memory_space<vmem>>, %arg4: memref<8x1xf32, #tpu.memory_space<vmem>>, %arg5: memref<1x8x384xf32, #tpu.memory_space<vmem>>, %arg6: memref<2x4x512xf32, #tpu.memory_space<vmem>>, %arg7: memref<2x!tpu.dma_semaphore, #tpu.memory_space<semaphore_mem>>) attributes {dimension_semantics = [#tpu.dimension_semantics<parallel>, #tpu.dimension_semantics<arbitrary>], iteration_bounds = array<i64: 2, 1>, scalar_prefetch = 0 : i64, scratch_operands = 2 : i64, tpu.core_type = #tpu.core_type<tc>, window_params = [{}, {pipeline_mode = #tpu.pipeline_mode<synchronous>, transform_indices = @transform_1, window_bounds = array<i64: 9, 8, 4>}, {pipeline_mode = #tpu.pipeline_mode<synchronous>, transform_indices = @transform_2, window_bounds = array<i64: 8, 1>}, {transform_indices = @transform_3, window_bounds = array<i64: 1, 8, 384>}]} {
    %c2_i32 = arith.constant 2 : i32
    %c0_i32 = arith.constant 0 : i32
    %0 = arith.cmpi eq, %c2_i32, %c0_i32 : i32
    %c1_i32 = arith.constant 1 : i32
    %1 = arith.select %0, %c1_i32, %c2_i32 : i32
    %2 = arith.remsi %arg1, %1 : i32
    %c0_i32_0 = arith.constant 0 : i32
    %3 = arith.cmpi ne, %2, %c0_i32_0 : i32
    %c0_i32_1 = arith.constant 0 : i32
    %4 = arith.cmpi slt, %2, %c0_i32_1 : i32
    %c0_i32_2 = arith.constant 0 : i32
    %5 = arith.cmpi slt, %1, %c0_i32_2 : i32
    %6 = arith.xori %4, %5 : i1
    %7 = arith.andi %6, %3 : i1
    %8 = arith.addi %2, %1 : i32
    %9 = arith.select %7, %8, %2 : i32
    %c0_i32_3 = arith.constant 0 : i32
    %10 = arith.cmpi eq, %arg1, %c0_i32_3 : i32
    %11 = arith.extui %10 : i1 to i32
    %c0_i32_4 = arith.constant 0 : i32
    %12 = arith.cmpi ne, %11, %c0_i32_4 : i32
    scf.if %12 {
      %c0_i32_73 = arith.constant 0 : i32
      %c0_i32_74 = arith.constant 0 : i32
      %c0_i32_75 = arith.constant 0 : i32
      %c0_i32_76 = arith.constant 0 : i32
      %94 = tpu.memref_slice %arg2[%arg0, %c0_i32_75, %c0_i32_76] : memref<2x4x522xf32, #tpu.memory_space<any>> -> memref<1x4x512xf32, #tpu.memory_space<any>>
      %95 = tpu.memref_squeeze %94 : memref<1x4x512xf32, #tpu.memory_space<any>> -> memref<4x512xf32, #tpu.memory_space<any>>
      %c0_i32_77 = arith.constant 0 : i32
      %c0_i32_78 = arith.constant 0 : i32
      %96 = tpu.memref_slice %arg6[%c0_i32_73, %c0_i32_77, %c0_i32_78] : memref<2x4x512xf32, #tpu.memory_space<vmem>> -> memref<1x4x512xf32, #tpu.memory_space<vmem>>
      %97 = tpu.memref_squeeze %96 : memref<1x4x512xf32, #tpu.memory_space<vmem>> -> memref<4x512xf32, #tpu.memory_space<vmem>>
      %98 = tpu.memref_slice %arg7[%c0_i32_74] : memref<2x!tpu.dma_semaphore, #tpu.memory_space<semaphore_mem>> -> memref<1x!tpu.dma_semaphore, #tpu.memory_space<semaphore_mem>>
      %99 = tpu.memref_squeeze %98 : memref<1x!tpu.dma_semaphore, #tpu.memory_space<semaphore_mem>> -> memref<!tpu.dma_semaphore, #tpu.memory_space<semaphore_mem>>
      tpu.enqueue_dma source(%95 : memref<4x512xf32, #tpu.memory_space<any>>) target(%97 : memref<4x512xf32, #tpu.memory_space<vmem>>) target_semaphore(%99 : memref<!tpu.dma_semaphore, #tpu.memory_space<semaphore_mem>>)
    } else {
    }
    %c1_i32_5 = arith.constant 1 : i32
    %13 = arith.addi %arg1, %c1_i32_5 : i32
    %c1_i32_6 = arith.constant 1 : i32
    %14 = arith.cmpi slt, %13, %c1_i32_6 : i32
    %15 = arith.extui %14 : i1 to i32
    %c0_i32_7 = arith.constant 0 : i32
    %16 = arith.cmpi ne, %15, %c0_i32_7 : i32
    scf.if %16 {
      %c1_i32_73 = arith.constant 1 : i32
      %94 = arith.addi %arg1, %c1_i32_73 : i32
      %c1_i32_74 = arith.constant 1 : i32
      %95 = arith.subi %c1_i32_74, %9 : i32
      %c384_i32_75 = arith.constant 384 : i32
      %96 = arith.muli %94, %c384_i32_75 : i32
      %c0_i32_76 = arith.constant 0 : i32
      %97 = tpu.memref_slice %arg2[%arg0, %c0_i32_76, %96] : memref<2x4x522xf32, #tpu.memory_space<any>> -> memref<1x4x512xf32, #tpu.memory_space<any>>
      %98 = tpu.memref_squeeze %97 : memref<1x4x512xf32, #tpu.memory_space<any>> -> memref<4x512xf32, #tpu.memory_space<any>>
      %c0_i32_77 = arith.constant 0 : i32
      %c0_i32_78 = arith.constant 0 : i32
      %99 = tpu.memref_slice %arg6[%95, %c0_i32_77, %c0_i32_78] : memref<2x4x512xf32, #tpu.memory_space<vmem>> -> memref<1x4x512xf32, #tpu.memory_space<vmem>>
      %100 = tpu.memref_squeeze %99 : memref<1x4x512xf32, #tpu.memory_space<vmem>> -> memref<4x512xf32, #tpu.memory_space<vmem>>
      %101 = tpu.memref_slice %arg7[%95] : memref<2x!tpu.dma_semaphore, #tpu.memory_space<semaphore_mem>> -> memref<1x!tpu.dma_semaphore, #tpu.memory_space<semaphore_mem>>
      %102 = tpu.memref_squeeze %101 : memref<1x!tpu.dma_semaphore, #tpu.memory_space<semaphore_mem>> -> memref<!tpu.dma_semaphore, #tpu.memory_space<semaphore_mem>>
      tpu.enqueue_dma source(%98 : memref<4x512xf32, #tpu.memory_space<any>>) target(%100 : memref<4x512xf32, #tpu.memory_space<vmem>>) target_semaphore(%102 : memref<!tpu.dma_semaphore, #tpu.memory_space<semaphore_mem>>)
    } else {
    }
    %c384_i32 = arith.constant 384 : i32
    %17 = arith.muli %arg1, %c384_i32 : i32
    %c0_i32_8 = arith.constant 0 : i32
    %18 = tpu.memref_slice %arg2[%arg0, %c0_i32_8, %17] : memref<2x4x522xf32, #tpu.memory_space<any>> -> memref<1x4x512xf32, #tpu.memory_space<any>>
    %19 = tpu.memref_squeeze %18 : memref<1x4x512xf32, #tpu.memory_space<any>> -> memref<4x512xf32, #tpu.memory_space<any>>
    %c0_i32_9 = arith.constant 0 : i32
    %c0_i32_10 = arith.constant 0 : i32
    %20 = tpu.memref_slice %arg6[%9, %c0_i32_9, %c0_i32_10] : memref<2x4x512xf32, #tpu.memory_space<vmem>> -> memref<1x4x512xf32, #tpu.memory_space<vmem>>
    %21 = tpu.memref_squeeze %20 : memref<1x4x512xf32, #tpu.memory_space<vmem>> -> memref<4x512xf32, #tpu.memory_space<vmem>>
    %22 = tpu.memref_slice %arg7[%9] : memref<2x!tpu.dma_semaphore, #tpu.memory_space<semaphore_mem>> -> memref<1x!tpu.dma_semaphore, #tpu.memory_space<semaphore_mem>>
    %23 = tpu.memref_squeeze %22 : memref<1x!tpu.dma_semaphore, #tpu.memory_space<semaphore_mem>> -> memref<!tpu.dma_semaphore, #tpu.memory_space<semaphore_mem>>
    tpu.wait_dma2 semaphore(%23 : memref<!tpu.dma_semaphore, #tpu.memory_space<semaphore_mem>>) src(%19 : memref<4x512xf32, #tpu.memory_space<any>>) dst(%21 : memref<4x512xf32, #tpu.memory_space<vmem>>)
    %cst = arith.constant 0.000000e+00 : f32
    %24 = vector.broadcast %cst : f32 to vector<8x384xf32>
    %c0_i32_11 = arith.constant 0 : i32
    %c0_i32_12 = arith.constant 0 : i32
    %25 = tpu.memref_slice %arg6[%9, %c0_i32_11, %c0_i32_12] : memref<2x4x512xf32, #tpu.memory_space<vmem>> -> memref<1x4x512xf32, #tpu.memory_space<vmem>>
    %26 = tpu.memref_squeeze %25 : memref<1x4x512xf32, #tpu.memory_space<vmem>> -> memref<4x512xf32, #tpu.memory_space<vmem>>
    %c0 = arith.constant 0 : index
    %c0_13 = arith.constant 0 : index
    %27 = vector.load %26[%c0, %c0_13] : memref<4x512xf32, #tpu.memory_space<vmem>>, vector<4x384xf32>
    %c0_14 = arith.constant 0 : index
    %c0_15 = arith.constant 0 : index
    %c0_16 = arith.constant 0 : index
    %28 = vector.load %arg3[%c0_14, %c0_15, %c0_16] : memref<9x8x4xf32, #tpu.memory_space<vmem>>, vector<1x8x4xf32>
    %29 = vector.shape_cast %28 : vector<1x8x4xf32> to vector<8x4xf32>
    %cst_17 = arith.constant dense<0.000000e+00> : vector<8x384xf32>
    %30 = tpu.matmul %29, %27, %cst_17 {dimension_numbers = #tpu.dot_dimension_numbers<[1], [0], [0], [1], [0, 0, 1, 1], [], []>} : vector<8x4xf32>, vector<4x384xf32>, vector<8x384xf32> -> vector<8x384xf32>
    %31 = arith.addf %24, %30 : vector<8x384xf32>
    %c0_i32_18 = arith.constant 0 : i32
    %c0_i32_19 = arith.constant 0 : i32
    %32 = tpu.memref_slice %arg6[%9, %c0_i32_18, %c0_i32_19] : memref<2x4x512xf32, #tpu.memory_space<vmem>> -> memref<1x4x512xf32, #tpu.memory_space<vmem>>
    %33 = tpu.memref_squeeze %32 : memref<1x4x512xf32, #tpu.memory_space<vmem>> -> memref<4x512xf32, #tpu.memory_space<vmem>>
    %c0_20 = arith.constant 0 : index
    %c1 = arith.constant 1 : index
    %34 = vector.load %33[%c0_20, %c1] : memref<4x512xf32, #tpu.memory_space<vmem>>, vector<4x384xf32>
    %c1_21 = arith.constant 1 : index
    %c0_22 = arith.constant 0 : index
    %c0_23 = arith.constant 0 : index
    %35 = vector.load %arg3[%c1_21, %c0_22, %c0_23] : memref<9x8x4xf32, #tpu.memory_space<vmem>>, vector<1x8x4xf32>
    %36 = vector.shape_cast %35 : vector<1x8x4xf32> to vector<8x4xf32>
    %cst_24 = arith.constant dense<0.000000e+00> : vector<8x384xf32>
    %37 = tpu.matmul %36, %34, %cst_24 {dimension_numbers = #tpu.dot_dimension_numbers<[1], [0], [0], [1], [0, 0, 1, 1], [], []>} : vector<8x4xf32>, vector<4x384xf32>, vector<8x384xf32> -> vector<8x384xf32>
    %38 = arith.addf %31, %37 : vector<8x384xf32>
    %c0_i32_25 = arith.constant 0 : i32
    %c0_i32_26 = arith.constant 0 : i32
    %39 = tpu.memref_slice %arg6[%9, %c0_i32_25, %c0_i32_26] : memref<2x4x512xf32, #tpu.memory_space<vmem>> -> memref<1x4x512xf32, #tpu.memory_space<vmem>>
    %40 = tpu.memref_squeeze %39 : memref<1x4x512xf32, #tpu.memory_space<vmem>> -> memref<4x512xf32, #tpu.memory_space<vmem>>
    %c0_27 = arith.constant 0 : index
    %c2 = arith.constant 2 : index
    %41 = vector.load %40[%c0_27, %c2] : memref<4x512xf32, #tpu.memory_space<vmem>>, vector<4x384xf32>
    %c2_28 = arith.constant 2 : index
    %c0_29 = arith.constant 0 : index
    %c0_30 = arith.constant 0 : index
    %42 = vector.load %arg3[%c2_28, %c0_29, %c0_30] : memref<9x8x4xf32, #tpu.memory_space<vmem>>, vector<1x8x4xf32>
    %43 = vector.shape_cast %42 : vector<1x8x4xf32> to vector<8x4xf32>
    %cst_31 = arith.constant dense<0.000000e+00> : vector<8x384xf32>
    %44 = tpu.matmul %43, %41, %cst_31 {dimension_numbers = #tpu.dot_dimension_numbers<[1], [0], [0], [1], [0, 0, 1, 1], [], []>} : vector<8x4xf32>, vector<4x384xf32>, vector<8x384xf32> -> vector<8x384xf32>
    %45 = arith.addf %38, %44 : vector<8x384xf32>
    %c0_i32_32 = arith.constant 0 : i32
    %c0_i32_33 = arith.constant 0 : i32
    %46 = tpu.memref_slice %arg6[%9, %c0_i32_32, %c0_i32_33] : memref<2x4x512xf32, #tpu.memory_space<vmem>> -> memref<1x4x512xf32, #tpu.memory_space<vmem>>
    %47 = tpu.memref_squeeze %46 : memref<1x4x512xf32, #tpu.memory_space<vmem>> -> memref<4x512xf32, #tpu.memory_space<vmem>>
    %c0_34 = arith.constant 0 : index
    %c18 = arith.constant 18 : index
    %48 = vector.load %47[%c0_34, %c18] : memref<4x512xf32, #tpu.memory_space<vmem>>, vector<4x384xf32>
    %c3 = arith.constant 3 : index
    %c0_35 = arith.constant 0 : index
    %c0_36 = arith.constant 0 : index
    %49 = vector.load %arg3[%c3, %c0_35, %c0_36] : memref<9x8x4xf32, #tpu.memory_space<vmem>>, vector<1x8x4xf32>
    %50 = vector.shape_cast %49 : vector<1x8x4xf32> to vector<8x4xf32>
    %cst_37 = arith.constant dense<0.000000e+00> : vector<8x384xf32>
    %51 = tpu.matmul %50, %48, %cst_37 {dimension_numbers = #tpu.dot_dimension_numbers<[1], [0], [0], [1], [0, 0, 1, 1], [], []>} : vector<8x4xf32>, vector<4x384xf32>, vector<8x384xf32> -> vector<8x384xf32>
    %52 = arith.addf %45, %51 : vector<8x384xf32>
    %c0_i32_38 = arith.constant 0 : i32
    %c0_i32_39 = arith.constant 0 : i32
    %53 = tpu.memref_slice %arg6[%9, %c0_i32_38, %c0_i32_39] : memref<2x4x512xf32, #tpu.memory_space<vmem>> -> memref<1x4x512xf32, #tpu.memory_space<vmem>>
    %54 = tpu.memref_squeeze %53 : memref<1x4x512xf32, #tpu.memory_space<vmem>> -> memref<4x512xf32, #tpu.memory_space<vmem>>
    %c0_40 = arith.constant 0 : index
    %c19 = arith.constant 19 : index
    %55 = vector.load %54[%c0_40, %c19] : memref<4x512xf32, #tpu.memory_space<vmem>>, vector<4x384xf32>
    %c4 = arith.constant 4 : index
    %c0_41 = arith.constant 0 : index
    %c0_42 = arith.constant 0 : index
    %56 = vector.load %arg3[%c4, %c0_41, %c0_42] : memref<9x8x4xf32, #tpu.memory_space<vmem>>, vector<1x8x4xf32>
    %57 = vector.shape_cast %56 : vector<1x8x4xf32> to vector<8x4xf32>
    %cst_43 = arith.constant dense<0.000000e+00> : vector<8x384xf32>
    %58 = tpu.matmul %57, %55, %cst_43 {dimension_numbers = #tpu.dot_dimension_numbers<[1], [0], [0], [1], [0, 0, 1, 1], [], []>} : vector<8x4xf32>, vector<4x384xf32>, vector<8x384xf32> -> vector<8x384xf32>
    %59 = arith.addf %52, %58 : vector<8x384xf32>
    %c0_i32_44 = arith.constant 0 : i32
    %c0_i32_45 = arith.constant 0 : i32
    %60 = tpu.memref_slice %arg6[%9, %c0_i32_44, %c0_i32_45] : memref<2x4x512xf32, #tpu.memory_space<vmem>> -> memref<1x4x512xf32, #tpu.memory_space<vmem>>
    %61 = tpu.memref_squeeze %60 : memref<1x4x512xf32, #tpu.memory_space<vmem>> -> memref<4x512xf32, #tpu.memory_space<vmem>>
    %c0_46 = arith.constant 0 : index
    %c20 = arith.constant 20 : index
    %62 = vector.load %61[%c0_46, %c20] : memref<4x512xf32, #tpu.memory_space<vmem>>, vector<4x384xf32>
    %c5 = arith.constant 5 : index
    %c0_47 = arith.constant 0 : index
    %c0_48 = arith.constant 0 : index
    %63 = vector.load %arg3[%c5, %c0_47, %c0_48] : memref<9x8x4xf32, #tpu.memory_space<vmem>>, vector<1x8x4xf32>
    %64 = vector.shape_cast %63 : vector<1x8x4xf32> to vector<8x4xf32>
    %cst_49 = arith.constant dense<0.000000e+00> : vector<8x384xf32>
    %65 = tpu.matmul %64, %62, %cst_49 {dimension_numbers = #tpu.dot_dimension_numbers<[1], [0], [0], [1], [0, 0, 1, 1], [], []>} : vector<8x4xf32>, vector<4x384xf32>, vector<8x384xf32> -> vector<8x384xf32>
    %66 = arith.addf %59, %65 : vector<8x384xf32>
    %c0_i32_50 = arith.constant 0 : i32
    %c0_i32_51 = arith.constant 0 : i32
    %67 = tpu.memref_slice %arg6[%9, %c0_i32_50, %c0_i32_51] : memref<2x4x512xf32, #tpu.memory_space<vmem>> -> memref<1x4x512xf32, #tpu.memory_space<vmem>>
    %68 = tpu.memref_squeeze %67 : memref<1x4x512xf32, #tpu.memory_space<vmem>> -> memref<4x512xf32, #tpu.memory_space<vmem>>
    %c0_52 = arith.constant 0 : index
    %c36 = arith.constant 36 : index
    %69 = vector.load %68[%c0_52, %c36] : memref<4x512xf32, #tpu.memory_space<vmem>>, vector<4x384xf32>
    %c6 = arith.constant 6 : index
    %c0_53 = arith.constant 0 : index
    %c0_54 = arith.constant 0 : index
    %70 = vector.load %arg3[%c6, %c0_53, %c0_54] : memref<9x8x4xf32, #tpu.memory_space<vmem>>, vector<1x8x4xf32>
    %71 = vector.shape_cast %70 : vector<1x8x4xf32> to vector<8x4xf32>
    %cst_55 = arith.constant dense<0.000000e+00> : vector<8x384xf32>
    %72 = tpu.matmul %71, %69, %cst_55 {dimension_numbers = #tpu.dot_dimension_numbers<[1], [0], [0], [1], [0, 0, 1, 1], [], []>} : vector<8x4xf32>, vector<4x384xf32>, vector<8x384xf32> -> vector<8x384xf32>
    %73 = arith.addf %66, %72 : vector<8x384xf32>
    %c0_i32_56 = arith.constant 0 : i32
    %c0_i32_57 = arith.constant 0 : i32
    %74 = tpu.memref_slice %arg6[%9, %c0_i32_56, %c0_i32_57] : memref<2x4x512xf32, #tpu.memory_space<vmem>> -> memref<1x4x512xf32, #tpu.memory_space<vmem>>
    %75 = tpu.memref_squeeze %74 : memref<1x4x512xf32, #tpu.memory_space<vmem>> -> memref<4x512xf32, #tpu.memory_space<vmem>>
    %c0_58 = arith.constant 0 : index
    %c37 = arith.constant 37 : index
    %76 = vector.load %75[%c0_58, %c37] : memref<4x512xf32, #tpu.memory_space<vmem>>, vector<4x384xf32>
    %c7 = arith.constant 7 : index
    %c0_59 = arith.constant 0 : index
    %c0_60 = arith.constant 0 : index
    %77 = vector.load %arg3[%c7, %c0_59, %c0_60] : memref<9x8x4xf32, #tpu.memory_space<vmem>>, vector<1x8x4xf32>
    %78 = vector.shape_cast %77 : vector<1x8x4xf32> to vector<8x4xf32>
    %cst_61 = arith.constant dense<0.000000e+00> : vector<8x384xf32>
    %79 = tpu.matmul %78, %76, %cst_61 {dimension_numbers = #tpu.dot_dimension_numbers<[1], [0], [0], [1], [0, 0, 1, 1], [], []>} : vector<8x4xf32>, vector<4x384xf32>, vector<8x384xf32> -> vector<8x384xf32>
    %80 = arith.addf %73, %79 : vector<8x384xf32>
    %c0_i32_62 = arith.constant 0 : i32
    %c0_i32_63 = arith.constant 0 : i32
    %81 = tpu.memref_slice %arg6[%9, %c0_i32_62, %c0_i32_63] : memref<2x4x512xf32, #tpu.memory_space<vmem>> -> memref<1x4x512xf32, #tpu.memory_space<vmem>>
    %82 = tpu.memref_squeeze %81 : memref<1x4x512xf32, #tpu.memory_space<vmem>> -> memref<4x512xf32, #tpu.memory_space<vmem>>
    %c0_64 = arith.constant 0 : index
    %c38 = arith.constant 38 : index
    %83 = vector.load %82[%c0_64, %c38] : memref<4x512xf32, #tpu.memory_space<vmem>>, vector<4x384xf32>
    %c8 = arith.constant 8 : index
    %c0_65 = arith.constant 0 : index
    %c0_66 = arith.constant 0 : index
    %84 = vector.load %arg3[%c8, %c0_65, %c0_66] : memref<9x8x4xf32, #tpu.memory_space<vmem>>, vector<1x8x4xf32>
    %85 = vector.shape_cast %84 : vector<1x8x4xf32> to vector<8x4xf32>
    %cst_67 = arith.constant dense<0.000000e+00> : vector<8x384xf32>
    %86 = tpu.matmul %85, %83, %cst_67 {dimension_numbers = #tpu.dot_dimension_numbers<[1], [0], [0], [1], [0, 0, 1, 1], [], []>} : vector<8x4xf32>, vector<4x384xf32>, vector<8x384xf32> -> vector<8x384xf32>
    %87 = arith.addf %80, %86 : vector<8x384xf32>
    %c0_68 = arith.constant 0 : index
    %c0_69 = arith.constant 0 : index
    %88 = vector.load %arg4[%c0_68, %c0_69] : memref<8x1xf32, #tpu.memory_space<vmem>>, vector<8x1xf32>
    %89 = vector.broadcast %88 : vector<8x1xf32> to vector<8x384xf32>
    %90 = arith.addf %87, %89 : vector<8x384xf32>
    %c0_70 = arith.constant 0 : index
    %c0_71 = arith.constant 0 : index
    %c0_72 = arith.constant 0 : index
    %91 = vector.load %arg5[%c0_70, %c0_71, %c0_72] : memref<1x8x384xf32, #tpu.memory_space<vmem>>, vector<1x8x384xf32>
    %92 = vector.shape_cast %91 : vector<1x8x384xf32> to vector<8x384xf32>
    %93 = vector.shape_cast %90 : vector<8x384xf32> to vector<1x8x384xf32>
    tpu.vector_store %arg5[%c0_70, %c0_71, %c0_72], %93 {strides = array<i32>} : memref<1x8x384xf32, #tpu.memory_space<vmem>>, vector<1x8x384xf32>,
    return
  }
  func.func @transform_1(%arg0: i32, %arg1: i32) -> (i32, i32, i32) {
    %c0_i32 = arith.constant 0 : i32
    %c0_i32_0 = arith.constant 0 : i32
    %c0_i32_1 = arith.constant 0 : i32
    %c0_i32_2 = arith.constant 0 : i32
    return %c0_i32, %c0_i32_0, %c0_i32_1 : i32, i32, i32
  }
  func.func @transform_2(%arg0: i32, %arg1: i32) -> (i32, i32) {
    %c0_i32 = arith.constant 0 : i32
    %c0_i32_0 = arith.constant 0 : i32
    %c0_i32_1 = arith.constant 0 : i32
    return %c0_i32, %c0_i32_0 : i32, i32
  }
  func.func @transform_3(%arg0: i32, %arg1: i32) -> (i32, i32, i32) {
    %c0_i32 = arith.constant 0 : i32
    %c0_i32_0 = arith.constant 0 : i32
    return %arg0, %c0_i32, %arg1 : i32, i32, i32
  }
}

</mosaic_0001>

<bundles_post_ra>
// kernel: tc_conv2d_forward.1
= control target key start
LH: loop header
LB: loop body
LE: loop exit
PB: predicated region body
PF: predicated region fallthrough
CT: control target
= control target key end

     0   :  { %s2172_s12 = smov 0   ;;  %s2174_s13 = smov 0   ;;  %s2343_s0 = inlined_call_operand.vmem [shape: f32[2,4,522], index: 0, kind: input, shape index: {}]   ;;  %s2344_s1 = inlined_call_operand.vmem [shape: f32[9,8,4], index: 1, kind: input, shape index: {}]   ;;  %s2345_s2 = inlined_call_operand.vmem [shape: f32[8,1], index: 2, kind: input, shape index: {}]   ;;  %s2346_s3 = inlined_call_operand.vmem [shape: f32[2,8,384], index: 3, kind: output, shape index: {}]  }
   0x1   :  { %s2176_s14 = smov 0  }
   0x2 LB: > { %s25_s15 = sadd.s32 1, %s2135_s13  ;;  %p1946_p0 = scmp.ge.s32.totalorder %s2139_s14, 1  ;;  %s2139_s14 = sphi %s2176_s14, %s13_s14   ;;  %s2135_s13 = sphi %s2174_s13, %s2348_s13   ;;  %s2131_s12 = sphi %s2172_s12, %s2347_s12  }
   0x3   : > { %p27_p1 = scmp.ge.s32.totalorder %s25_s15, 2  ;;  %p117_p2 = scmp.lt.s32.totalorder %s2139_s14, 3 }
   0x5   : > { %s2350_s15 = smov (%p27_p1, %s25_s15), 0  ;;  %p118_p3 = pnand %p1946_p0, %p117_p2 }
   0x6   : > { %p139_p4 = scmp.lt.s32.totalorder (!%p118_p3), %s2131_s12, 1  ;;  %s2010_s16 = smul.u32 (!%p118_p3), 20, %s2131_s12 }
   0x7   : > { %121 = sbr.rel (%p118_p3) target bundleno = 398 (0x18e), region = 28 }
   0x8   : > { %s166_s19 = scalar_lea.vmem (!%p118_p3), %s2343_s0, %s2010_s16 }
   0xc   : > { %s2352_s12 = smov (!%p139_p4, %s2131_s12), 1  ;;  %v200_v0 = vld [vmem:[%s166_s19] sm:$0xff]  ;;  %v202_v1 = vld [vmem:[%s166_s19 + $0x8] sm:$0xff] }
   0xd   : > { %s2076_s20 = smul.u32 24, %s2352_s12  ;;  %201 = vst [vmem:[#allocation2] sm:$0xff] %v200_v0  ;;  %203 = vst [vmem:[#allocation2 + $0x8] sm:$0xff] %v202_v1 }
   0xf   : > { %s2196_s23 = scalar_lea.vmem %s2346_s3, %s2076_s20 }
  0x10   : > { %211 = vsyncadd [#allocation3], 256 }
  0x11   : > { %2127 = dma.done.wait [#allocation3], 256 }
  0x12   : > { %2128 = vsyncadd [#allocation3], 4294967040  ;;  %v2141_v2 = vmov 0.0   ;;  %vm2142_vm0 = vmmov 0   ;;  %s2143_s24 = smov 127   ;;  %s2144_s25 = smov 126  }
  0x13   : > { %380 = vmatprep.mubr.f32.mxu0 %v2141_v2  ;;  %2031 = vmatprep.subr.mxu1 %v2141_v2  ;;  %s2145_s26 = smov 110   ;;  %s2146_s27 = smov 109   ;;  %v2150_v7 = vmov 0   ;;  %v1821_v8 = vld [vmem:[%s2345_s2] sm:$0xff]  ;;  %vm301_vm1 = vcmask 1039360   ;;  %vm309_vm2 = vcmask 1043456  }
  0x14   : > { %2033 = vmatprep.mubr.msk.f32.mxu1 %vm2142_vm0, %v2141_v2  ;;  %v286_v3 = vld [vmem:[#allocation2 + $0x8] sm:$0xff]  ;;  %v2202_v4 = vld [vmem:[#allocation2] sm:$0xff]  ;;  %s2147_s28 = smov 108   ;;  %s2148_s29 = smov 92   ;;  %2112 = vset.pattern.permute.xlu0 %v2150_v7  ;;  %vm305_vm3 = vcmask 31744   ;;  %vm626_vm4 = vcmask 1031168  }
  0x15   : > { %297 = vrot.lane.b32.xlu0 %v286_v3, %s2143_s24  ;;  %293 = vrot.lane.b32.xlu1 %v2202_v4, %s2143_s24  ;;  %v291_v5 = vcombine.high %v2202_v4, %v2202_v4  ;;  %v292_v6 = vcombine.high %v286_v3, %v286_v3  ;;  %s2149_s30 = smov 91   ;;  %s2151_s4 = smov 90   ;;  %v1953_v15 = vld [vmem:[%s2344_s1 + $0x8] sm:$0xff]  ;;  %v284_v21 = vld [vmem:[%s2344_s1] sm:$0xff]  ;;  %vm799_vm5 = vcmask 900096   ;;  %vm972_vm6 = vcmask 891904  }
  0x16   : > { %v283_v20 = vld [vmem:[#allocation2 + $0x8] sm:$0xf]  ;;  %v1964_v26 = vld [vmem:[%s2344_s1 + $0x10] sm:$0xff]  ;;  %v1970_v32 = vld [vmem:[%s2344_s1 + $0x18] sm:$0xff]  ;;  %vm1145_vm7 = vcmask 883712   ;;  %vm1318_vm8 = vcmask 752640  }
  0x17   : > { %v1976_v40 = vld [vmem:[%s2344_s1 + $0x20] sm:$0xff]  ;;  %v1982_v48 = vld [vmem:[%s2344_s1 + $0x28] sm:$0xff]  ;;  %v1988_v56 = vld [vmem:[%s2344_s1 + $0x30] sm:$0xff]  ;;  %vm1491_vm9 = vcmask 744448   ;;  %vm1664_vm10 = vcmask 736256  }
  0x18   : > { %v1994_v0 = vld [vmem:[%s2344_s1 + $0x38] sm:$0xff] }
  0x19   : > { %622 = vrot.lane.b32.xlu1 %v286_v3, %s2144_s25  ;;  %295 = vrot.lane.b32.xlu0 %v291_v5, %s2143_s24 }
  0x1d   : > { %299 = vrot.lane.b32.xlu1 %v292_v6, %s2143_s24  ;;  %620 = vrot.lane.b32.xlu0 %v291_v5, %s2144_s25 }
  0x21   : > { %624 = vrot.lane.b32.xlu1 %v292_v6, %s2144_s25  ;;  %618 = vrot.lane.b32.xlu0 %v2202_v4, %s2144_s25 }
  0x25   : > { %795 = vrot.lane.b32.xlu1 %v286_v3, %s2145_s26  ;;  %793 = vrot.lane.b32.xlu0 %v291_v5, %s2145_s26 }
  0x29   : > { %797 = vrot.lane.b32.xlu1 %v292_v6, %s2145_s26  ;;  %791 = vrot.lane.b32.xlu0 %v2202_v4, %s2145_s26 }
  0x2d   : > { %968 = vrot.lane.b32.xlu1 %v286_v3, %s2146_s27  ;;  %966 = vrot.lane.b32.xlu0 %v291_v5, %s2146_s27 }
  0x31   : > { %970 = vrot.lane.b32.xlu1 %v292_v6, %s2146_s27  ;;  %964 = vrot.lane.b32.xlu0 %v2202_v4, %s2146_s27 }
  0x35   : > { %1141 = vrot.lane.b32.xlu1 %v286_v3, %s2147_s28  ;;  %1139 = vrot.lane.b32.xlu0 %v291_v5, %s2147_s28 }
  0x39   : > { %1143 = vrot.lane.b32.xlu1 %v292_v6, %s2147_s28  ;;  %1137 = vrot.lane.b32.xlu0 %v2202_v4, %s2147_s28 }
  0x3d   : > { %1314 = vrot.lane.b32.xlu1 %v286_v3, %s2148_s29  ;;  %1312 = vrot.lane.b32.xlu0 %v291_v5, %s2148_s29 }
  0x41   : > { %1316 = vrot.lane.b32.xlu1 %v292_v6, %s2148_s29  ;;  %1310 = vrot.lane.b32.xlu0 %v2202_v4, %s2148_s29 }
  0x45   : > { %1487 = vrot.lane.b32.xlu1 %v286_v3, %s2149_s30  ;;  %1485 = vrot.lane.b32.xlu0 %v291_v5, %s2149_s30 }
  0x49   : > { %1489 = vrot.lane.b32.xlu1 %v292_v6, %s2149_s30  ;;  %1483 = vrot.lane.b32.xlu0 %v2202_v4, %s2149_s30 }
  0x4d   : > { %1660 = vrot.lane.b32.xlu1 %v286_v3, %s2151_s4  ;;  %1658 = vrot.lane.b32.xlu0 %v291_v5, %s2151_s4 }
  0x51   : > { %1662 = vrot.lane.b32.xlu1 %v292_v6, %s2151_s4  ;;  %1656 = vrot.lane.b32.xlu0 %v2202_v4, %s2151_s4 }
  0x55   : > { %1824 = vperm.xlu0 %2112, %v1821_v8  }
  0x87   : > { %v298_v9 = vpop.permute.xlu0 %297  ;;  %v294_v10 = vpop.permute.xlu1 %293 }
  0x8b   : > { %v623_v11 = vpop.permute.xlu1 %622  ;;  %v296_v12 = vpop.permute.xlu0 %295 }
  0x8c   : > { %v303_v13 = vsel %vm301_vm1, %v296_v12, %v298_v9  ;;  %v302_v14 = vsel %vm301_vm1, %v294_v10, %v296_v12 }
  0x8d   : > { %1954 = vmatprep.subr.msk.mxu0 %vm309_vm2, %v303_v13 }
  0x8e   : > { %1955 = vmatpush1.msk.msra.mxu0 %vm309_vm2, %v302_v14 }
  0x8f   : > { %v300_v16 = vpop.permute.xlu1 %299  ;;  %v621_v17 = vpop.permute.xlu0 %620  ;;  %1959 = vmatprep.subr.msk.mxu0 %vm309_vm2, %v291_v5  ;;  %1956 = vmatmul.mubr.msk.f32.vlgmr.msra.gmra.mxu0 %vm305_vm3, %v1953_v15 }
  0x90   : > { %v628_v18 = vsel %vm626_vm4, %v621_v17, %v623_v11  ;;  %1960 = vmatpush1.msk.msra.mxu0 %vm309_vm2, %v2202_v4  ;;  %v304_v19 = vsel %vm301_vm1, %v298_v9, %v300_v16  ;;  %533 = vmatprep.mubr.f32.mxu0 %v2141_v2  ;;  %v2000_v9 = vld [vmem:[%s2344_s1 + $0x40] sm:$0xff] }
  0x91   : > { %2032 = vmatpush3.msk.msra.mxu1 %vm309_vm2, %v304_v19  ;;  %1965 = vmatprep.subr.msk.mxu0 %vm309_vm2, %v628_v18 }
  0x92   : > { %2034 = vmatmul.mubr.msk.f32.vlgmr.msra.gmra.mxu1 %vm305_vm3, %v1953_v15  ;;  %2036 = vmatprep.subr.mxu1 %v2141_v2 }
  0x93   : > { %v625_v22 = vpop.permute.xlu1 %624  ;;  %v619_v23 = vpop.permute.xlu0 %618  ;;  %2037 = vmatpush3.msk.msra.mxu1 %vm309_vm2, %v283_v20  ;;  %1961 = vmatmul.mubr.msk.f32.vlgmr.msra.gmra.mxu0 %vm305_vm3, %v284_v21 }
  0x94   : > { %v629_v24 = vsel %vm626_vm4, %v623_v11, %v625_v22  ;;  %v627_v25 = vsel %vm626_vm4, %v619_v23, %v621_v17  ;;  %2038 = vmatprep.mubr.msk.f32.mxu1 %vm2142_vm0, %v2141_v2  ;;  %2041 = vmatprep.subr.mxu1 %v2141_v2 }
  0x95   : > { %1966 = vmatpush1.msk.msra.mxu0 %vm309_vm2, %v627_v25  ;;  %703 = vmatprep.mubr.f32.mxu0 %v2141_v2 }
  0x96   : > { %2039 = vmatmul.mubr.msk.f32.vlgmr.msra.gmra.mxu1 %vm305_vm3, %v284_v21 }
  0x97   : > { %2042 = vmatpush3.msk.msra.mxu1 %vm309_vm2, %v629_v24  ;;  %v796_v27 = vpop.permute.xlu1 %795  ;;  %v794_v28 = vpop.permute.xlu0 %793  ;;  %2043 = vmatprep.mubr.msk.f32.mxu1 %vm2142_vm0, %v2141_v2 }
  0x98   : > { %v801_v29 = vsel %vm799_vm5, %v794_v28, %v796_v27  ;;  %2046 = vmatprep.subr.mxu1 %v2141_v2  ;;  %1967 = vmatmul.mubr.msk.f32.vlgmr.msra.gmra.mxu0 %vm305_vm3, %v1964_v26 }
  0x99   : > { %1971 = vmatprep.subr.msk.mxu0 %vm309_vm2, %v801_v29  ;;  %876 = vmatprep.mubr.f32.mxu0 %v2141_v2 }
  0x9a   : > { %2044 = vmatmul.mubr.msk.f32.vlgmr.msra.gmra.mxu1 %vm305_vm3, %v1964_v26 }
  0x9b   : > { %v798_v30 = vpop.permute.xlu1 %797  ;;  %v792_v31 = vpop.permute.xlu0 %791  ;;  %2048 = vmatprep.mubr.msk.f32.mxu1 %vm2142_vm0, %v2141_v2 }
  0x9c   : > { %v802_v33 = vsel %vm799_vm5, %v796_v27, %v798_v30  ;;  %v800_v34 = vsel %vm799_vm5, %v792_v31, %v794_v28 }
  0x9d   : > { %1972 = vmatpush1.msk.msra.mxu0 %vm309_vm2, %v800_v34  ;;  %2047 = vmatpush3.msk.msra.mxu1 %vm309_vm2, %v802_v33 }
  0x9e   : > { %2051 = vmatprep.subr.mxu1 %v2141_v2  ;;  %1973 = vmatmul.mubr.msk.f32.vlgmr.msra.gmra.mxu0 %vm305_vm3, %v1970_v32 }
  0x9f   : > { %v969_v35 = vpop.permute.xlu1 %968  ;;  %v967_v36 = vpop.permute.xlu0 %966  ;;  %2049 = vmatmul.mubr.msk.f32.vlgmr.msra.gmra.mxu1 %vm305_vm3, %v1970_v32  ;;  %1049 = vmatprep.mubr.f32.mxu0 %v2141_v2 }
  0xa0   : > { %v974_v37 = vsel %vm972_vm6, %v967_v36, %v969_v35  ;;  %2053 = vmatprep.mubr.msk.f32.mxu1 %vm2142_vm0, %v2141_v2 }
  0xa1   : > { %1977 = vmatprep.subr.msk.mxu0 %vm309_vm2, %v974_v37 }
  0xa3   : > { %v971_v38 = vpop.permute.xlu1 %970  ;;  %v965_v39 = vpop.permute.xlu0 %964 }
  0xa4   : > { %v975_v41 = vsel %vm972_vm6, %v969_v35, %v971_v38  ;;  %v973_v42 = vsel %vm972_vm6, %v965_v39, %v967_v36 }
  0xa5   : > { %1978 = vmatpush1.msk.msra.mxu0 %vm309_vm2, %v973_v42  ;;  %2052 = vmatpush3.msk.msra.mxu1 %vm309_vm2, %v975_v41 }
  0xa6   : > { %1979 = vmatmul.mubr.msk.f32.vlgmr.msra.gmra.mxu0 %vm305_vm3, %v1976_v40  ;;  %2056 = vmatprep.subr.mxu1 %v2141_v2 }
  0xa7   : > { %v1142_v43 = vpop.permute.xlu1 %1141  ;;  %v1140_v44 = vpop.permute.xlu0 %1139  ;;  %2054 = vmatmul.mubr.msk.f32.vlgmr.msra.gmra.mxu1 %vm305_vm3, %v1976_v40  ;;  %1222 = vmatprep.mubr.f32.mxu0 %v2141_v2 }
  0xa8   : > { %v1147_v45 = vsel %vm1145_vm7, %v1140_v44, %v1142_v43  ;;  %2058 = vmatprep.mubr.msk.f32.mxu1 %vm2142_vm0, %v2141_v2 }
  0xa9   : > { %1983 = vmatprep.subr.msk.mxu0 %vm309_vm2, %v1147_v45 }
  0xab   : > { %v1144_v46 = vpop.permute.xlu1 %1143  ;;  %v1138_v47 = vpop.permute.xlu0 %1137 }
  0xac   : > { %v1148_v49 = vsel %vm1145_vm7, %v1142_v43, %v1144_v46  ;;  %v1146_v50 = vsel %vm1145_vm7, %v1138_v47, %v1140_v44 }
  0xad   : > { %1984 = vmatpush1.msk.msra.mxu0 %vm309_vm2, %v1146_v50  ;;  %2057 = vmatpush3.msk.msra.mxu1 %vm309_vm2, %v1148_v49 }
  0xae   : > { %1985 = vmatmul.mubr.msk.f32.vlgmr.msra.gmra.mxu0 %vm305_vm3, %v1982_v48  ;;  %2059 = vmatmul.mubr.msk.f32.vlgmr.msra.gmra.mxu1 %vm305_vm3, %v1982_v48 }
  0xaf   : > { %v1315_v51 = vpop.permute.xlu1 %1314  ;;  %v1313_v52 = vpop.permute.xlu0 %1312  ;;  %2061 = vmatprep.subr.mxu1 %v2141_v2  ;;  %1395 = vmatprep.mubr.f32.mxu0 %v2141_v2 }
  0xb0   : > { %v1320_v53 = vsel %vm1318_vm8, %v1313_v52, %v1315_v51  ;;  %2063 = vmatprep.mubr.msk.f32.mxu1 %vm2142_vm0, %v2141_v2 }
  0xb1   : > { %1989 = vmatprep.subr.msk.mxu0 %vm309_vm2, %v1320_v53 }
  0xb3   : > { %v1317_v54 = vpop.permute.xlu1 %1316  ;;  %v1311_v55 = vpop.permute.xlu0 %1310 }
  0xb4   : > { %v1321_v57 = vsel %vm1318_vm8, %v1315_v51, %v1317_v54  ;;  %v1319_v58 = vsel %vm1318_vm8, %v1311_v55, %v1313_v52 }
  0xb5   : > { %1990 = vmatpush1.msk.msra.mxu0 %vm309_vm2, %v1319_v58  ;;  %2062 = vmatpush3.msk.msra.mxu1 %vm309_vm2, %v1321_v57 }
  0xb6   : > { %1991 = vmatmul.mubr.msk.f32.vlgmr.msra.gmra.mxu0 %vm305_vm3, %v1988_v56  ;;  %2064 = vmatmul.mubr.msk.f32.vlgmr.msra.gmra.mxu1 %vm305_vm3, %v1988_v56 }
  0xb7   : > { %v1488_v59 = vpop.permute.xlu1 %1487  ;;  %v1486_v60 = vpop.permute.xlu0 %1485  ;;  %2066 = vmatprep.subr.mxu1 %v2141_v2  ;;  %1568 = vmatprep.mubr.f32.mxu0 %v2141_v2 }
  0xb8   : > { %v1493_v61 = vsel %vm1491_vm9, %v1486_v60, %v1488_v59  ;;  %2068 = vmatprep.mubr.msk.f32.mxu1 %vm2142_vm0, %v2141_v2 }
  0xb9   : > { %1995 = vmatprep.subr.msk.mxu0 %vm309_vm2, %v1493_v61 }
  0xbb   : > { %v1490_v62 = vpop.permute.xlu1 %1489  ;;  %v1484_v63 = vpop.permute.xlu0 %1483 }
  0xbc   : > { %v1494_v1 = vsel %vm1491_vm9, %v1488_v59, %v1490_v62  ;;  %v1492_v3 = vsel %vm1491_vm9, %v1484_v63, %v1486_v60 }
  0xbd   : > { %1996 = vmatpush1.msk.msra.mxu0 %vm309_vm2, %v1492_v3  ;;  %2067 = vmatpush3.msk.msra.mxu1 %vm309_vm2, %v1494_v1 }
  0xbe   : > { %1997 = vmatmul.mubr.msk.f32.vlgmr.msra.gmra.mxu0 %vm305_vm3, %v1994_v0  ;;  %2069 = vmatmul.mubr.msk.f32.vlgmr.msra.gmra.mxu1 %vm305_vm3, %v1994_v0 }
  0xbf   : > { %v1661_v4 = vpop.permute.xlu1 %1660  ;;  %v1659_v5 = vpop.permute.xlu0 %1658  ;;  %2071 = vmatprep.subr.mxu1 %v2141_v2  ;;  %1741 = vmatprep.mubr.f32.mxu0 %v2141_v2 }
  0xc0   : > { %v1666_v6 = vsel %vm1664_vm10, %v1659_v5, %v1661_v4  ;;  %2073 = vmatprep.mubr.msk.f32.mxu1 %vm2142_vm0, %v2141_v2 }
  0xc1   : > { %2001 = vmatprep.subr.msk.mxu0 %vm309_vm2, %v1666_v6 }
  0xc3   : > { %v1663_v7 = vpop.permute.xlu1 %1662  ;;  %v1657_v8 = vpop.permute.xlu0 %1656 }
  0xc4   : > { %v1667_v10 = vsel %vm1664_vm10, %v1661_v4, %v1663_v7  ;;  %v1665_v11 = vsel %vm1664_vm10, %v1657_v8, %v1659_v5 }
  0xc5   : > { %2002 = vmatpush1.msk.msra.mxu0 %vm309_vm2, %v1665_v11  ;;  %2072 = vmatpush3.msk.msra.mxu1 %vm309_vm2, %v1667_v10 }
  0xc6   : > { %2003 = vmatmul.mubr.msk.f32.vlgmr.msra.gmra.mxu0 %vm305_vm3, %v2000_v9  ;;  %2074 = vmatmul.mubr.msk.f32.vlgmr.msra.gmra.mxu1 %vm305_vm3, %v2000_v9 }
  0xd0   : > { %v1825_v63 = vpop.permute.xlu0 %1824 }
 0x14f   : > { %v382_v12 = vpop.f32.mrf.mxu0 }
 0x151   : > { %v384_v2 = vpop.f32.mrf.mxu0 }
 0x152   : > { %v453_v13 = vpop.f32.mrf.mxu1 }
 0x153   : > { %v535_v14 = vpop.f32.mrf.mxu0 }
 0x154   : > { %v2035_v15 = vpop.f32.mrf.mxu1  ;;  %v536_v33 = vadd.f32 %v535_v14, %v382_v12 }
 0x155   : > { %v537_v17 = vpop.f32.mrf.mxu0 }
 0x156   : > { %v606_v16 = vpop.f32.mrf.mxu1  ;;  %v538_v36 = vadd.f32 %v537_v17, %v384_v2 }
 0x157   : > { %v607_v34 = vadd.f32 %v606_v16, %v453_v13 }
 0x158   : > { %v2040_v18 = vpop.f32.mrf.mxu1  ;;  %v705_v20 = vpop.f32.mrf.mxu0 }
 0x159   : > { %v780_v37 = vadd.f32 %v705_v20, %v536_v33 }
 0x15a   : > { %v776_v19 = vpop.f32.mrf.mxu1  ;;  %v707_v23 = vpop.f32.mrf.mxu0 }
 0x15b   : > { %v782_v38 = vadd.f32 %v776_v19, %v607_v34  ;;  %v781_v42 = vadd.f32 %v707_v23, %v538_v36 }
 0x15c   : > { %v2045_v21 = vpop.f32.mrf.mxu1 }
 0x15e   : > { %v878_v25 = vpop.f32.mrf.mxu0 }
 0x15f   : > { %v949_v22 = vpop.f32.mrf.mxu1  ;;  %v953_v43 = vadd.f32 %v878_v25, %v780_v37 }
 0x160   : > { %v880_v27 = vpop.f32.mrf.mxu0  ;;  %v955_v44 = vadd.f32 %v949_v22, %v782_v38 }
 0x161   : > { %v2050_v24 = vpop.f32.mrf.mxu1  ;;  %v954_v46 = vadd.f32 %v880_v27, %v781_v42 }
 0x166   : > { %v1051_v29 = vpop.f32.mrf.mxu0 }
 0x167   : > { %v1122_v26 = vpop.f32.mrf.mxu1  ;;  %v1126_v47 = vadd.f32 %v1051_v29, %v953_v43 }
 0x168   : > { %v1053_v31 = vpop.f32.mrf.mxu0  ;;  %v1128_v48 = vadd.f32 %v1122_v26, %v955_v44 }
 0x169   : > { %v2055_v28 = vpop.f32.mrf.mxu1  ;;  %v1127_v53 = vadd.f32 %v1053_v31, %v954_v46 }
 0x16e   : > { %v1295_v30 = vpop.f32.mrf.mxu1  ;;  %v1224_v35 = vpop.f32.mrf.mxu0 }
 0x16f   : > { %v1299_v54 = vadd.f32 %v1224_v35, %v1126_v47  ;;  %v1301_v55 = vadd.f32 %v1295_v30, %v1128_v48 }
 0x170   : > { %v2060_v32 = vpop.f32.mrf.mxu1  ;;  %v1226_v40 = vpop.f32.mrf.mxu0 }
 0x171   : > { %v1300_v56 = vadd.f32 %v1226_v40, %v1127_v53 }
 0x176   : > { %v1468_v39 = vpop.f32.mrf.mxu1  ;;  %v1397_v45 = vpop.f32.mrf.mxu0 }
 0x177   : > { %v1472_v57 = vadd.f32 %v1397_v45, %v1299_v54  ;;  %v1474_v58 = vadd.f32 %v1468_v39, %v1301_v55 }
 0x178   : > { %v2065_v41 = vpop.f32.mrf.mxu1  ;;  %v1399_v49 = vpop.f32.mrf.mxu0 }
 0x179   : > { %v1473_v60 = vadd.f32 %v1399_v49, %v1300_v56 }
 0x17e   : > { %v1641_v50 = vpop.f32.mrf.mxu1  ;;  %v1570_v51 = vpop.f32.mrf.mxu0 }
 0x17f   : > { %v1645_v61 = vadd.f32 %v1570_v51, %v1472_v57  ;;  %v1647_v62 = vadd.f32 %v1641_v50, %v1474_v58 }
 0x180   : > { %v2070_v52 = vpop.f32.mrf.mxu1  ;;  %v1572_v59 = vpop.f32.mrf.mxu0 }
 0x181   : > { %v1646_v3 = vadd.f32 %v1572_v59, %v1473_v60 }
 0x186   : > { %v1743_v0 = vpop.f32.mrf.mxu0  ;;  %v1814_v1 = vpop.f32.mrf.mxu1 }
 0x187   : > { %v1818_v4 = vadd.f32 %v1743_v0, %v1645_v61  ;;  %v1820_v5 = vadd.f32 %v1814_v1, %v1647_v62 }
 0x188   : > { %v1745_v6 = vpop.f32.mrf.mxu0  ;;  %v2075_v7 = vpop.f32.mrf.mxu1 }
 0x189   : > { %v1827_v8 = vadd.f32 %v1825_v63, %v1818_v4  ;;  %v1829_v9 = vadd.f32 %v1825_v63, %v1820_v5  ;;  %v1819_v10 = vadd.f32 %v1745_v6, %v1646_v3 }
 0x18b   : > { %1830 = vst [vmem:[%s2196_s23] sm:$0xff] %v1827_v8  ;;  %1832 = vst [vmem:[%s2196_s23 + $0x10] sm:$0xff] %v1829_v9  ;;  %v1828_v11 = vadd.f32 %v1825_v63, %v1819_v10 }
 0x18d   : > { %1831 = vst [vmem:[%s2196_s23 + $0x8] sm:$0xff] %v1828_v11 }
 0x18e PF: > { %s13_s14 = sadd.s32 1, %s2139_s14   ;;  %s2347_s12 = smov %s2135_s13 }
 0x18f   : > { %p10_p5 = scmp.ge.s32.totalorder %s13_s14, 4   ;;  %s2348_s13 = smov %s2350_s15 }
 0x191   :  { %12 = sbr.rel (!%p10_p5) target bundleno = 2 (0x2), region = 162 }
 0x196   :  { %1863 = vsyncmov [#allocation3] }
 0x199   :  { %s1864_s29 = vpop.sfrf %1863 }
 0x19a   :  { %p2008_p6 = scmp.ne.s32.totalorder %s1864_s29, 0 }
 0x19c   :  { %1868 = shalt.err (%p2008_p6)  }
 0x19d   :  { %1870 = vsyncmov [#allocation3 + $0x1] }
 0x1a0   :  { %s1871_s30 = vpop.sfrf %1870 }
 0x1a1   :  { %p2009_p7 = scmp.ne.s32.totalorder %s1871_s30, 0 }
 0x1a3   :  { %1875 = shalt.err (%p2009_p7)  }

</bundles_post_ra>
